<compile_context>
chip_gen: v7x
topology: tpu7x:2x2x1
jax: 0.10.0
libtpu: 0.0.40
codegen_flags: <defaults>
</compile_context>

<pallas_src>
import jax
import jax.numpy as jnp
from jax.experimental import pallas as pl
from jax.experimental.pallas import tpu as pltpu


def gru_seq_kernel(tok_ref, emb_ref, h0_ref, wih_ref, bih_ref,
                   whr_ref, whz_ref, whn_ref, bhr_ref, bhz_ref, bhn_ref,
                   out_ref,
                   gir_scr, giz_scr, gin_scr):
    """Runs the full GRU recurrence over T timesteps in one kernel invocation.

    tok_ref : (T, 1) int32 token ids (VMEM).
    emb_ref : (V, H) embedding table (resident in VMEM).
    h0_ref  : (1, H) initial hidden state.
    wih_ref : (H, 3H) = weight_ih_l0.T           bih_ref : (1, 3H)
    wh*_ref : (H, H)  per-gate blocks of weight_hh_l0.T   bh*_ref : (1, H)
    out_ref : (T, H) hidden state after each step (single writeback DMA at the end).
    g*_scr  : (T, H) VMEM scratches holding the per-gate input-side pre-activations.
    """
    T, H = out_ref.shape
    V = emb_ref.shape[0]

    # --- Embedding gather as a one-hot MXU GEMM (no per-step HBM gather DMA). ---------
    tok = tok_ref[...]                                               # (T, 1) int32
    cols = jax.lax.broadcasted_iota(jnp.int32, (T, V), 1)            # (T, V)
    onehot = (cols == tok).astype(jnp.float32)                       # (T, V)
    x_all = jnp.dot(onehot, emb_ref[...],
                    preferred_element_type=jnp.float32)              # (T, H)

    # --- Input-side gate pre-activations for ALL timesteps in one GEMM (h-independent).
    gi_all = jnp.dot(x_all, wih_ref[...],
                     preferred_element_type=jnp.float32) + bih_ref[...]   # (T, 3H)
    # One-time static lane split (outside the serial loop) into per-gate scratches.
    gir_scr[...] = gi_all[:, 0:H]
    giz_scr[...] = gi_all[:, H:2 * H]
    gin_scr[...] = gi_all[:, 2 * H:3 * H]

    # Hoist loop-invariant reads out of the recurrence.
    whr = whr_ref[...]
    whz = whz_ref[...]
    whn = whn_ref[...]
    bhr = bhr_ref[...]
    bhz = bhz_ref[...]
    bhn = bhn_ref[...]

    def step(t, h):
        # Issue the three h-dependent MXU matmuls back-to-back (independent pushes).
        ghr = jnp.dot(h, whr, preferred_element_type=jnp.float32)    # (1, H)
        ghz = jnp.dot(h, whz, preferred_element_type=jnp.float32)    # (1, H)
        ghn = jnp.dot(h, whn, preferred_element_type=jnp.float32)    # (1, H)

        gir = gir_scr[pl.ds(t, 1), :]                                # (1, H)
        giz = giz_scr[pl.ds(t, 1), :]
        gin = gin_scr[pl.ds(t, 1), :]

        r = jax.nn.sigmoid(gir + ghr + bhr)
        z = jax.nn.sigmoid(giz + ghz + bhz)
        n = jnp.tanh(gin + r * (ghn + bhn))
        h_new = (1.0 - z) * n + z * h

        out_ref[pl.ds(t, 1), :] = h_new
        return h_new

    # T is static and small -> fully unroll so the LLO scheduler sees the whole chain.
    jax.lax.fori_loop(0, T, step, h0_ref[...], unroll=True)


def prepare_gru_params(embedding, w_ih, w_hh, b_ih, b_hh):
    """One-time parameter prep (transpose / cast / per-gate split hoisted off the call path)."""
    H = embedding.shape[1]
    w_ih = jnp.asarray(w_ih, jnp.float32)        # (3H, H), rows [r | z | n]
    w_hh = jnp.asarray(w_hh, jnp.float32)        # (3H, H)
    b_ih = jnp.asarray(b_ih, jnp.float32)        # (3H,)
    b_hh = jnp.asarray(b_hh, jnp.float32)        # (3H,)
    return {
        "emb": jnp.asarray(embedding, jnp.float32),        # (V, H)
        "wih_t": w_ih.T,                                   # (H, 3H)
        "bih": b_ih.reshape(1, 3 * H),                     # (1, 3H)
        "whr_t": w_hh[0:H].T,                              # (H, H)
        "whz_t": w_hh[H:2 * H].T,                          # (H, H)
        "whn_t": w_hh[2 * H:3 * H].T,                      # (H, H)
        "bhr": b_hh[0:H].reshape(1, H),                    # (1, H)
        "bhz": b_hh[H:2 * H].reshape(1, H),
        "bhn": b_hh[2 * H:3 * H].reshape(1, H),
    }


@jax.jit
def gru_encoder_forward(tokens, hidden, params):
    """tokens: (T,) int32; hidden: (1, 1, H).

    Returns (output, hidden_t):
      output   : (T, 1, H)  hidden state after each step (T == 1 matches the module).
      hidden_t : (1, 1, H)  final hidden state.
    """
    emb = params["emb"]
    V, H = emb.shape
    T = tokens.shape[0]

    # VMEM refs have no runtime bounds check; clamp untrusted token ids.
    # (PyTorch would raise on OOB ids; here they are remapped to valid rows.)
    tok2d = jnp.clip(tokens.astype(jnp.int32), 0, V - 1).reshape(T, 1)
    h0 = hidden.reshape(1, H).astype(jnp.float32)

    vmem = pl.BlockSpec(memory_space=pltpu.MemorySpace.VMEM)

    outputs = pl.pallas_call(
        gru_seq_kernel,
        out_shape=jax.ShapeDtypeStruct((T, H), jnp.float32),
        in_specs=[vmem] * 11,
        out_specs=vmem,
        scratch_shapes=[pltpu.VMEM((T, H), jnp.float32)] * 3,   # per-gate GI buffers
    )(tok2d, emb, h0,
      params["wih_t"], params["bih"],
      params["whr_t"], params["whz_t"], params["whn_t"],
      params["bhr"], params["bhz"], params["bhn"])

    output = outputs.reshape(T, 1, H)
    hidden_t = outputs[T - 1].reshape(1, 1, H)
    return output, hidden_t


def gru_encoder_reference(tokens, hidden, embedding, w_ih, w_hh, b_ih, b_hh):
    """Pure-JAX reference mirroring torch.nn.GRU over a (T,) token sequence."""
    H = hidden.shape[-1]

    def step(h, tok):
        x = embedding[tok].reshape(1, H)
        gi = x @ w_ih.T + b_ih
        gh = h @ w_hh.T + b_hh
        r = jax.nn.sigmoid(gi[:, 0:H] + gh[:, 0:H])
        z = jax.nn.sigmoid(gi[:, H:2 * H] + gh[:, H:2 * H])
        n = jnp.tanh(gi[:, 2 * H:3 * H] + r * gh[:, 2 * H:3 * H])
        h_new = (1.0 - z) * n + z * h
        return h_new, h_new

    h0 = hidden.reshape(1, H)
    h_final, outs = jax.lax.scan(step, h0, tokens)
    return outs.reshape(-1, 1, H), h_final.reshape(1, 1, H)


if __name__ == "__main__":
    input_size = 16    # vocab size V
    hidden_size = 32   # H

    key = jax.random.PRNGKey(0)
    k_emb, k_wih, k_whh, k_bih, k_bhh, k_tok = jax.random.split(key, 6)

    # Deterministic synthetic parameters (shapes match nn.Embedding + nn.GRU).
    embedding = jax.random.normal(k_emb, (input_size, hidden_size), jnp.float32)
    bound = 1.0 / jnp.sqrt(hidden_size)
    w_ih = jax.random.uniform(k_wih, (3 * hidden_size, hidden_size), jnp.float32, -bound, bound)
    w_hh = jax.random.uniform(k_whh, (3 * hidden_size, hidden_size), jnp.float32, -bound, bound)
    b_ih = jax.random.uniform(k_bih, (3 * hidden_size,), jnp.float32, -bound, bound)
    b_hh = jax.random.uniform(k_bhh, (3 * hidden_size,), jnp.float32, -bound, bound)

    params = prepare_gru_params(embedding, w_ih, w_hh, b_ih, b_hh)
    hidden0 = jnp.zeros((1, 1, hidden_size), jnp.float32)       # initHidden()

    # --- Single-step call: exactly the PyTorch module's forward(input, hidden) ---
    token = jnp.array([7], dtype=jnp.int32)                     # seq_len = 1
    output, hidden_t = gru_encoder_forward(token, hidden0, params)
    jax.block_until_ready((output, hidden_t))

    ref_out, ref_h = gru_encoder_reference(token, hidden0, embedding, w_ih, w_hh, b_ih, b_hh)
    assert output.shape == (1, 1, hidden_size) and hidden_t.shape == (1, 1, hidden_size)
    assert jnp.allclose(output, ref_out, atol=1e-4), "single-step output mismatch"
    assert jnp.allclose(hidden_t, ref_h, atol=1e-4), "single-step hidden mismatch"

    # --- Whole-sequence call: T encoder steps amortized in ONE pallas_call ---
    seq_len = 8
    tokens = jax.random.randint(k_tok, (seq_len,), 0, input_size, jnp.int32)
    out_seq, h_seq = gru_encoder_forward(tokens, hidden0, params)
    jax.block_until_ready((out_seq, h_seq))

    ref_out_seq, ref_h_seq = gru_encoder_reference(tokens, hidden0, embedding,
                                                   w_ih, w_hh, b_ih, b_hh)
    assert out_seq.shape == (seq_len, 1, hidden_size) and h_seq.shape == (1, 1, hidden_size)
    assert jnp.allclose(out_seq, ref_out_seq, atol=1e-4), "sequence output mismatch"
    assert jnp.allclose(h_seq, ref_h_seq, atol=1e-4), "sequence hidden mismatch"

    print("KERNEL_OK")
</pallas_src>

<mosaic_0001>
module attributes {stable_mosaic.version = 11 : i64} {
  func.func @gru_seq_kernel(%arg0: memref<1x1xi32, #tpu.memory_space<vmem>>, %arg1: memref<16x32xf32, #tpu.memory_space<vmem>>, %arg2: memref<1x32xf32, #tpu.memory_space<vmem>>, %arg3: memref<32x96xf32, #tpu.memory_space<vmem>>, %arg4: memref<1x96xf32, #tpu.memory_space<vmem>>, %arg5: memref<32x32xf32, #tpu.memory_space<vmem>>, %arg6: memref<32x32xf32, #tpu.memory_space<vmem>>, %arg7: memref<32x32xf32, #tpu.memory_space<vmem>>, %arg8: memref<1x32xf32, #tpu.memory_space<vmem>>, %arg9: memref<1x32xf32, #tpu.memory_space<vmem>>, %arg10: memref<1x32xf32, #tpu.memory_space<vmem>>, %arg11: memref<1x32xf32, #tpu.memory_space<vmem>>, %arg12: memref<1x32xf32, #tpu.memory_space<vmem>>, %arg13: memref<1x32xf32, #tpu.memory_space<vmem>>, %arg14: memref<1x32xf32, #tpu.memory_space<vmem>>) attributes {dimension_semantics = [], scalar_prefetch = 0 : i64, scratch_operands = 3 : i64, tpu.core_type = #tpu.core_type<tc>} {
    %c0 = arith.constant 0 : index
    %c0_0 = arith.constant 0 : index
    %0 = vector.load %arg0[%c0, %c0_0] : memref<1x1xi32, #tpu.memory_space<vmem>>, vector<1x1xi32>
    %1 = tpu.iota {dimensions = array<i32: 1>} : vector<1x16xi32>
    %2 = vector.broadcast %0 : vector<1x1xi32> to vector<1x16xi32>
    %3 = arith.cmpi eq, %1, %2 : vector<1x16xi32>
    %4 = arith.extui %3 : vector<1x16xi1> to vector<1x16xi32>
    %5 = arith.sitofp %4 : vector<1x16xi32> to vector<1x16xf32>
    %c0_1 = arith.constant 0 : index
    %c0_2 = arith.constant 0 : index
    %6 = vector.load %arg1[%c0_1, %c0_2] : memref<16x32xf32, #tpu.memory_space<vmem>>, vector<16x32xf32>
    %cst = arith.constant dense<0.000000e+00> : vector<1x32xf32>
    %7 = tpu.matmul %5, %6, %cst {dimension_numbers = #tpu.dot_dimension_numbers<[1], [0], [0], [1], [0, 0, 1, 1], [], []>} : vector<1x16xf32>, vector<16x32xf32>, vector<1x32xf32> -> vector<1x32xf32>
    %c0_3 = arith.constant 0 : index
    %c0_4 = arith.constant 0 : index
    %8 = vector.load %arg3[%c0_3, %c0_4] : memref<32x96xf32, #tpu.memory_space<vmem>>, vector<32x96xf32>
    %cst_5 = arith.constant dense<0.000000e+00> : vector<1x96xf32>
    %9 = tpu.matmul %7, %8, %cst_5 {dimension_numbers = #tpu.dot_dimension_numbers<[1], [0], [0], [1], [0, 0, 1, 1], [], []>} : vector<1x32xf32>, vector<32x96xf32>, vector<1x96xf32> -> vector<1x96xf32>
    %c0_6 = arith.constant 0 : index
    %c0_7 = arith.constant 0 : index
    %10 = vector.load %arg4[%c0_6, %c0_7] : memref<1x96xf32, #tpu.memory_space<vmem>>, vector<1x96xf32>
    %11 = arith.addf %9, %10 : vector<1x96xf32>
    %12 = vector.extract_strided_slice %11 {offsets = [0, 0], sizes = [1, 32], strides = [1, 1]} : vector<1x96xf32> to vector<1x32xf32>
    %c0_8 = arith.constant 0 : index
    %c0_9 = arith.constant 0 : index
    %13 = vector.load %arg12[%c0_8, %c0_9] : memref<1x32xf32, #tpu.memory_space<vmem>>, vector<1x32xf32>
    tpu.vector_store %arg12[%c0_8, %c0_9], %12 {strides = array<i32>} : memref<1x32xf32, #tpu.memory_space<vmem>>, vector<1x32xf32>,
    %14 = vector.extract_strided_slice %11 {offsets = [0, 32], sizes = [1, 32], strides = [1, 1]} : vector<1x96xf32> to vector<1x32xf32>
    %c0_10 = arith.constant 0 : index
    %c0_11 = arith.constant 0 : index
    %15 = vector.load %arg13[%c0_10, %c0_11] : memref<1x32xf32, #tpu.memory_space<vmem>>, vector<1x32xf32>
    tpu.vector_store %arg13[%c0_10, %c0_11], %14 {strides = array<i32>} : memref<1x32xf32, #tpu.memory_space<vmem>>, vector<1x32xf32>,
    %16 = vector.extract_strided_slice %11 {offsets = [0, 64], sizes = [1, 32], strides = [1, 1]} : vector<1x96xf32> to vector<1x32xf32>
    %c0_12 = arith.constant 0 : index
    %c0_13 = arith.constant 0 : index
    %17 = vector.load %arg14[%c0_12, %c0_13] : memref<1x32xf32, #tpu.memory_space<vmem>>, vector<1x32xf32>
    tpu.vector_store %arg14[%c0_12, %c0_13], %16 {strides = array<i32>} : memref<1x32xf32, #tpu.memory_space<vmem>>, vector<1x32xf32>,
    %c0_14 = arith.constant 0 : index
    %c0_15 = arith.constant 0 : index
    %18 = vector.load %arg5[%c0_14, %c0_15] : memref<32x32xf32, #tpu.memory_space<vmem>>, vector<32x32xf32>
    %c0_16 = arith.constant 0 : index
    %c0_17 = arith.constant 0 : index
    %19 = vector.load %arg6[%c0_16, %c0_17] : memref<32x32xf32, #tpu.memory_space<vmem>>, vector<32x32xf32>
    %c0_18 = arith.constant 0 : index
    %c0_19 = arith.constant 0 : index
    %20 = vector.load %arg7[%c0_18, %c0_19] : memref<32x32xf32, #tpu.memory_space<vmem>>, vector<32x32xf32>
    %c0_20 = arith.constant 0 : index
    %c0_21 = arith.constant 0 : index
    %21 = vector.load %arg8[%c0_20, %c0_21] : memref<1x32xf32, #tpu.memory_space<vmem>>, vector<1x32xf32>
    %c0_22 = arith.constant 0 : index
    %c0_23 = arith.constant 0 : index
    %22 = vector.load %arg9[%c0_22, %c0_23] : memref<1x32xf32, #tpu.memory_space<vmem>>, vector<1x32xf32>
    %c0_24 = arith.constant 0 : index
    %c0_25 = arith.constant 0 : index
    %23 = vector.load %arg10[%c0_24, %c0_25] : memref<1x32xf32, #tpu.memory_space<vmem>>, vector<1x32xf32>
    %c0_26 = arith.constant 0 : index
    %c0_27 = arith.constant 0 : index
    %24 = vector.load %arg2[%c0_26, %c0_27] : memref<1x32xf32, #tpu.memory_space<vmem>>, vector<1x32xf32>
    %c0_i32 = arith.constant 0 : i32
    %cst_28 = arith.constant dense<0.000000e+00> : vector<1x32xf32>
    %25 = tpu.matmul %24, %18, %cst_28 {dimension_numbers = #tpu.dot_dimension_numbers<[1], [0], [0], [1], [0, 0, 1, 1], [], []>} : vector<1x32xf32>, vector<32x32xf32>, vector<1x32xf32> -> vector<1x32xf32>
    %cst_29 = arith.constant dense<0.000000e+00> : vector<1x32xf32>
    %26 = tpu.matmul %24, %19, %cst_29 {dimension_numbers = #tpu.dot_dimension_numbers<[1], [0], [0], [1], [0, 0, 1, 1], [], []>} : vector<1x32xf32>, vector<32x32xf32>, vector<1x32xf32> -> vector<1x32xf32>
    %cst_30 = arith.constant dense<0.000000e+00> : vector<1x32xf32>
    %27 = tpu.matmul %24, %20, %cst_30 {dimension_numbers = #tpu.dot_dimension_numbers<[1], [0], [0], [1], [0, 0, 1, 1], [], []>} : vector<1x32xf32>, vector<32x32xf32>, vector<1x32xf32> -> vector<1x32xf32>
    %28 = arith.index_cast %c0_i32 : i32 to index
    %c0_31 = arith.constant 0 : index
    %29 = vector.load %arg12[%28, %c0_31] : memref<1x32xf32, #tpu.memory_space<vmem>>, vector<1x32xf32>
    %30 = arith.index_cast %c0_i32 : i32 to index
    %c0_32 = arith.constant 0 : index
    %31 = vector.load %arg13[%30, %c0_32] : memref<1x32xf32, #tpu.memory_space<vmem>>, vector<1x32xf32>
    %32 = arith.index_cast %c0_i32 : i32 to index
    %c0_33 = arith.constant 0 : index
    %33 = vector.load %arg14[%32, %c0_33] : memref<1x32xf32, #tpu.memory_space<vmem>>, vector<1x32xf32>
    %34 = arith.addf %29, %25 : vector<1x32xf32>
    %35 = arith.addf %34, %21 : vector<1x32xf32>
    %36 = arith.negf %35 : vector<1x32xf32>
    %37 = math.exp %36 : vector<1x32xf32>
    %cst_34 = arith.constant 1.000000e+00 : f32
    %38 = vector.broadcast %cst_34 : f32 to vector<1x32xf32>
    %39 = arith.addf %38, %37 : vector<1x32xf32>
    %40 = arith.divf %38, %39 : vector<1x32xf32>
    %41 = arith.addf %31, %26 : vector<1x32xf32>
    %42 = arith.addf %41, %22 : vector<1x32xf32>
    %43 = arith.negf %42 : vector<1x32xf32>
    %44 = math.exp %43 : vector<1x32xf32>
    %cst_35 = arith.constant 1.000000e+00 : f32
    %45 = vector.broadcast %cst_35 : f32 to vector<1x32xf32>
    %46 = arith.addf %45, %44 : vector<1x32xf32>
    %47 = arith.divf %45, %46 : vector<1x32xf32>
    %48 = arith.addf %27, %23 : vector<1x32xf32>
    %49 = arith.mulf %40, %48 : vector<1x32xf32>
    %50 = arith.addf %33, %49 : vector<1x32xf32>
    %51 = math.tanh %50 : vector<1x32xf32>
    %cst_36 = arith.constant 1.000000e+00 : f32
    %52 = vector.broadcast %cst_36 : f32 to vector<1x32xf32>
    %53 = arith.subf %52, %47 : vector<1x32xf32>
    %54 = arith.mulf %53, %51 : vector<1x32xf32>
    %55 = arith.mulf %47, %24 : vector<1x32xf32>
    %56 = arith.addf %54, %55 : vector<1x32xf32>
    %57 = arith.index_cast %c0_i32 : i32 to index
    %c0_37 = arith.constant 0 : index
    %58 = vector.load %arg11[%57, %c0_37] : memref<1x32xf32, #tpu.memory_space<vmem>>, vector<1x32xf32>
    tpu.vector_store %arg11[%57, %c0_37], %56 {strides = array<i32>} : memref<1x32xf32, #tpu.memory_space<vmem>>, vector<1x32xf32>,
    %c1_i32 = arith.constant 1 : i32
    return
  }
}

</mosaic_0001>

<bundles_post_ra>
// kernel: gru_encoder_forward.1
= control target key start
LH: loop header
LB: loop body
LE: loop exit
PB: predicated region body
PF: predicated region fallthrough
CT: control target
= control target key end

     0   :  { %s913_s0 = inlined_call_operand.<no memory space> [shape: s32[1,1], index: 0, kind: input, shape index: {}]   ;;  %s914_s1 = inlined_call_operand.vmem [shape: f32[16,32], index: 1, kind: input, shape index: {}]   ;;  %s915_s2 = inlined_call_operand.vmem [shape: f32[1,32], index: 2, kind: input, shape index: {}]   ;;  %s916_s3 = inlined_call_operand.vmem [shape: f32[32,96], index: 3, kind: input, shape index: {}]   ;;  %s917_s4 = inlined_call_operand.vmem [shape: f32[1,96], index: 4, kind: input, shape index: {}]   ;;  %s918_s5 = inlined_call_operand.hbm [shape: f32[32,32], index: 5, kind: input, shape index: {}]   ;;  %s919_s6 = inlined_call_operand.hbm [shape: f32[32,32], index: 6, kind: input, shape index: {}]   ;;  %s920_s7 = inlined_call_operand.hbm [shape: f32[32,32], index: 7, kind: input, shape index: {}]   ;;  %s921_s8 = inlined_call_operand.vmem [shape: f32[1,32], index: 8, kind: input, shape index: {}]   ;;  %s922_s9 = inlined_call_operand.vmem [shape: f32[1,32], index: 9, kind: input, shape index: {}]   ;;  %s923_s10 = inlined_call_operand.vmem [shape: f32[1,32], index: 10, kind: input, shape index: {}]   ;;  %s924_s11 = inlined_call_operand.vmem [shape: f32[1,32], index: 11, kind: output, shape index: {}]  }
   0x1   :  { %v16_v0 = vstv %s913_s0 }
   0x2   :  { %17 = vst [vmem:[#allocation5] sm:$0x1] %v16_v0 }
   0x3   :  { %18 = vsyncpa [#allocation7], 0 }
   0x4   :  { %19 = vsyncpa [#allocation9], 0  ;;  %s723_s19 = smov [#allocation8]   ;;  %s724_s21 = smov [#allocation6]  }
   0x5   :  { %s47_s20 = sshll.u32 %s723_s19, 4  ;;  %s35_s22 = sshll.u32 %s724_s21, 4  ;;  %s48_s20 = int_to_ptr.vmem [resolvable:$true] %s47_s20  ;;  %s797_s22 = int_to_ptr.vmem [resolvable:$true] %s35_s22 }
   0x6   :  { %s653_s25 = scalar_lea.hbm %s919_s6, 512 }
   0x7   :  { %p654_p0 = scmp.ne.s32.totalorder %s919_s6, %s653_s25  ;;  %p657_p1 = scmp.lt.u32.totalorder %s653_s25, %s919_s6 }
   0x9   :  { %p659_p2 = pnand %p657_p1, %p654_p0 }
   0xb   :  { %662 = shalt.err (!%p659_p2)
}
   0xc   :  { %s663_s29 = scalar_lea.vmem %s48_s20, 512  ;;  %p668_p4 = scmp.lt.s32.totalorder %s48_s20, %s48_s20 }
   0xd   :  { %p664_p3 = scmp.ne.s32.totalorder %s48_s20, %s663_s29  ;;  %p669_p5 = scmp.lt.s32.totalorder %s663_s29, %s663_s29 }
   0xf   :  { %p670_p6 = por %p669_p5, %p668_p4 }
  0x11   :  { %p671_p7 = pnand %p670_p6, %p664_p3 }
  0x13   :  { %674 = shalt.err (!%p671_p7)
}
  0x14   :  { %s725_s30 = smov 128   ;;  %s726_s12 = smov 8  }
  0x15   :  { %53 = dma.hbm_to_vmem [thread:$0]  %s919_s6, 512, %s48_s20, [#allocation9], %s725_s30, %s725_s30, %s726_s12  }
  0x16   :  { %s675_s17 = scalar_lea.hbm %s918_s5, 512 }
  0x17   :  { %p676_p8 = scmp.ne.s32.totalorder %s918_s5, %s675_s17  ;;  %p679_p9 = scmp.lt.u32.totalorder %s675_s17, %s918_s5 }
  0x19   :  { %p681_p10 = pnand %p679_p9, %p676_p8 }
  0x1b   :  { %684 = shalt.err (!%p681_p10)
}
  0x1c   :  { %s685_s24 = scalar_lea.vmem %s797_s22, 512  ;;  %p690_p12 = scmp.lt.s32.totalorder %s797_s22, %s797_s22 }
  0x1d   :  { %p686_p11 = scmp.ne.s32.totalorder %s797_s22, %s685_s24  ;;  %p691_p13 = scmp.lt.s32.totalorder %s685_s24, %s685_s24 }
  0x1f   :  { %p692_p0 = por %p691_p13, %p690_p12 }
  0x21   :  { %p693_p1 = pnand %p692_p0, %p686_p11 }
  0x23   :  { %696 = shalt.err (!%p693_p1)
}
  0x24   :  { %41 = dma.hbm_to_vmem [thread:$0]  %s918_s5, 512, %s797_s22, [#allocation7], %s725_s30, %s725_s30, %s726_s12  }
  0x25   :  { %s727_s25 = smov [#allocation10]   ;;  %s697_s0 = scalar_lea.hbm %s920_s7, 512 }
  0x26   :  { %s59_s26 = sshll.u32 %s727_s25, 4  ;;  %p698_p2 = scmp.ne.s32.totalorder %s920_s7, %s697_s0  ;;  %s60_s26 = int_to_ptr.vmem [resolvable:$true] %s59_s26 }
  0x27   :  { %p701_p3 = scmp.lt.u32.totalorder %s697_s0, %s920_s7 }
  0x29   :  { %p703_p4 = pnand %p701_p3, %p698_p2 }
  0x2b   :  { %706 = shalt.err (!%p703_p4)
}
  0x2c   :  { %s707_s16 = scalar_lea.vmem %s60_s26, 512  ;;  %p712_p6 = scmp.lt.s32.totalorder %s60_s26, %s60_s26 }
  0x2d   :  { %p708_p5 = scmp.ne.s32.totalorder %s60_s26, %s707_s16  ;;  %p713_p7 = scmp.lt.s32.totalorder %s707_s16, %s707_s16 }
  0x2f   :  { %p714_p8 = por %p713_p7, %p712_p6 }
  0x31   :  { %p715_p9 = pnand %p714_p8, %p708_p5 }
  0x33   :  { %718 = shalt.err (!%p715_p9)
}
  0x34   :  { %65 = dma.hbm_to_vmem [thread:$0]  %s920_s7, 512, %s60_s26, [#allocation9], %s725_s30, %s725_s30, %s726_s12  }
  0x35   :  { %719 = dma.done.wait [#allocation7], 512  }
  0x36   :  { %720 = vsyncadd [#allocation7], 4294966784 }
  0x37   :  { %721 = dma.done.wait [#allocation9], 1024  }
  0x38   :  { %722 = vsyncadd [#allocation9], 4294966272  ;;  %v728_v1 = vmov 0   ;;  %v81_v2 = vld [vmem:[#allocation5] sm:$0x1]  ;;  %v95_v4 = vld [vmem:[%s914_s1 + $0x8] sm:$0xff]  ;;  %v82_v14 = vlaneseq }
  0x39   :  { %642 = vset.pattern.permute.xlu0 %v728_v1  ;;  %v94_v3 = vld [vmem:[%s914_s1] sm:$0xff]  ;;  %v729_v5 = vmov 0.0|0.0   ;;  %vm730_vm0 = vmmov 0   ;;  %v731_v7 = vmov 0.0   ;;  %v171_v9 = vld [vmem:[%s916_s3 + $0x8] sm:$0xff]  ;;  %v172_v10 = vld [vmem:[%s916_s3 + $0x10] sm:$0xff] }
  0x3a   :  { %85 = vperm.xlu0 %642, %v81_v2   ;;  %604 = vmatprep.subr.bf16.mxu0 %v729_v5  ;;  %v605_v6 = vpack.c.bf16 %v95_v4, %v94_v3  ;;  %v170_v8 = vld [vmem:[%s916_s3] sm:$0xff]  ;;  %v173_v12 = vld [vmem:[%s916_s3 + $0x18] sm:$0xff]  ;;  %v88_v15 = vshrl.u32 %v82_v14, 7  ;;  %v83_v17 = vand.u32 127, %v82_v14  ;;  %vm96_vm1 = vcmask 130048   ;;  %v261_v22 = vld [vmem:[#allocation6 + $0x8] sm:$0xff] }
  0x3b   :  { %607 = vmatprep.subr.bf16.mxu1 %v729_v5  ;;  %557 = vmatprep.mubr.msk.f32.mxu0 %vm730_vm0, %v731_v7  ;;  %v608_v11 = vpack.c.bf16 %v171_v9, %v170_v8  ;;  %v611_v13 = vpack.c.bf16 %v173_v12, %v172_v10  ;;  %v260_v21 = vld [vmem:[#allocation6] sm:$0xff]  ;;  %v262_v23 = vld [vmem:[#allocation6 + $0x10] sm:$0xff]  ;;  %v263_v25 = vld [vmem:[#allocation6 + $0x18] sm:$0xff]  ;;  %vm175_vm3 = vcmask 261120   ;;  %vm249_vm4 = vcmask 253952   ;;  %s732_s27 = smov 64  }
  0x3c   :  { %606 = vmatpush3.bf16.msra.mxu0 %v605_v6  ;;  %568 = vmatprep.mubr.msk.f32.mxu1 %vm730_vm0, %v731_v7  ;;  %v89_v16 = vsub.s32 0, %v88_v15  ;;  %v614_v24 = vpack.c.bf16 %v261_v22, %v260_v21  ;;  %v617_v26 = vpack.c.bf16 %v263_v25, %v262_v23  ;;  %v268_v27 = vld [vmem:[#allocation10] sm:$0xff]  ;;  %v269_v28 = vld [vmem:[#allocation10 + $0x8] sm:$0xff]  ;;  %v879_v29 = vld [vmem:[%s915_s2] sm:$0x1]  ;;  %s733_s28 = smov 96  }
  0x3d   :  { %613 = vmatprep.subr.bf16.mxu0 %v729_v5  ;;  %609 = vmatpush3.bf16.msra.mxu1 %v608_v11  ;;  %v626_v30 = vpack.c.bf16 %v269_v28, %v268_v27  ;;  %v270_v31 = vld [vmem:[#allocation10 + $0x10] sm:$0xff]  ;;  %v271_v32 = vld [vmem:[#allocation10 + $0x18] sm:$0xff]  ;;  %v264_v34 = vld [vmem:[#allocation8] sm:$0xff] }
  0x3e   :  { %610 = vmatprep.subr.bf16.mxu1 %v729_v5  ;;  %v629_v33 = vpack.c.bf16 %v271_v32, %v270_v31  ;;  %v265_v35 = vld [vmem:[#allocation8 + $0x8] sm:$0xff]  ;;  %v266_v37 = vld [vmem:[#allocation8 + $0x10] sm:$0xff]  ;;  %v267_v38 = vld [vmem:[#allocation8 + $0x18] sm:$0xff] }
  0x3f   :  { %v620_v36 = vpack.c.bf16 %v265_v35, %v264_v34  ;;  %v623_v41 = vpack.c.bf16 %v267_v38, %v266_v37  ;;  %v174_v46 = vld [vmem:[%s917_s4] sm:$0x1] }
  0x40   :  { %v272_v52 = vld [vmem:[%s921_s8] sm:$0x1] }
  0x41   :  { %612 = vmatpush3.bf16.msra.mxu1 %v611_v13  ;;  %v274_v59 = vld [vmem:[%s923_s10] sm:$0x1] }
  0x42   :  { %619 = vmatprep.subr.bf16.mxu1 %v729_v5  ;;  %v273_v1 = vld [vmem:[%s922_s9] sm:$0x1] }
  0xb9   :  { %v86_v18 = vpop.permute.xlu0 %85 }
  0xba   :  { %v90_v19 = vrot.slane %v86_v18, %v89_v16 }
  0xbc   :  { %vm91_vm2 = vcmp.eq.s32.totalorder %v83_v17, %v90_v19 }
  0xbd   :  { %v522_v20 = vsel %vm91_vm2, 1.0, %v731_v7 }
  0xbe   :  { %558 = vmatmul.mubr.msk.f32.vlgmr.msra.gmra.mrb[0].mxu0 %vm96_vm1, %v522_v20 }
  0xbf   :  { %579 = vmatprep.mubr.msk.f32.mxu0 %vm730_vm0, %v731_v7  ;;  %615 = vmatpush3.bf16.msra.mxu0 %v614_v24 }
  0xc0   :  { %616 = vmatprep.subr.bf16.mxu0 %v729_v5 }
  0xc3   :  { %618 = vmatpush3.bf16.msra.mxu0 %v617_v26 }
  0xc4   :  { %625 = vmatprep.subr.bf16.mxu0 %v729_v5 }
  0xc6   :  { %580 = vmatmul.mubr.msk.f32.vlgmr.msra.gmra.mrb[2].mxu0 %vm175_vm3, %v879_v29 }
  0xc7   :  { %627 = vmatpush3.bf16.msra.mxu0 %v626_v30  ;;  %601 = vmatprep.mubr.msk.f32.mxu0 %vm730_vm0, %v731_v7 }
  0xc8   :  { %628 = vmatprep.subr.bf16.mxu0 %v729_v5 }
  0xcb   :  { %630 = vmatpush3.bf16.msra.mxu0 %v629_v33 }
  0xce   :  { %602 = vmatmul.mubr.msk.f32.vlgmr.msra.gmra.mrb[4].mxu0 %vm175_vm3, %v879_v29 }
 0x191   :  { %v166_v39 = vpop.f32.mrb[0].mxu0 }
 0x192   :  { %v559_v40 = vpop.f32.mrb[1].mxu0  ;;  %569 = vmatmul.mubr.msk.f32.vlgmr.msra.gmra.mrb[0].mxu1 %vm175_vm3, %v166_v39 }
 0x193   :  { %621 = vmatpush3.bf16.msra.mxu1 %v620_v36  ;;  %590 = vmatprep.mubr.msk.f32.mxu1 %vm730_vm0, %v731_v7 }
 0x194   :  { %622 = vmatprep.subr.bf16.mxu1 %v729_v5 }
 0x197   :  { %624 = vmatpush3.bf16.msra.mxu1 %v623_v41 }
 0x199   :  { %v345_v42 = vpop.f32.mrb[2].mxu0 }
 0x19a   :  { %591 = vmatmul.mubr.msk.f32.vlgmr.msra.gmra.mrb[2].mxu1 %vm175_vm3, %v879_v29  ;;  %v581_v43 = vpop.f32.mrb[3].mxu0 }
 0x1a1   :  { %v504_v44 = vpop.f32.mrb[4].mxu0 }
 0x1a2   :  { %v603_v45 = vpop.f32.mrb[5].mxu0  ;;  %v505_v60 = vadd.f32 %v504_v44, %v274_v59 }
 0x265   :  { %v245_v47 = vpop.f32.mrb[0].mxu1 }
 0x266   :  { %v246_v48 = vadd.f32 %v245_v47, %v174_v46  ;;  %v570_v49 = vpop.f32.mrb[1].mxu1 }
 0x268   :  { %250 = vst.msk [vmem:[#allocation2] sm:$0x1] %vm249_vm4, %v246_v48  ;;  %256 = vrot.lane.b32.xlu1 %v246_v48, %s732_s27  ;;  %252 = vrot.lane.b32.xlu0 %v246_v48, %s733_s28 }
 0x26d   :  { %v415_v50 = vpop.f32.mrb[2].mxu1 }
 0x26e   :  { %v592_v51 = vpop.f32.mrb[3].mxu1 }
 0x26f   :  { %v419_v53 = vld [vmem:[#allocation2] sm:$0x1] }
 0x270   :  { %v422_v54 = vadd.f32 %v419_v53, %v345_v42 }
 0x272   :  { %v423_v55 = vadd.f32 %v422_v54, %v272_v52 }
 0x274   :  { %v527_v56 = vmul.f32 -1.442695, %v423_v55 }
 0x276   :  { %643 = vpow2.f32 %v527_v56 }
 0x280   :  { %v644_v57 = vpop.eup %643 }
 0x281   :  { %v427_v58 = vadd.f32 1.0, %v644_v57 }
 0x283   :  { %645 = vrcp.f32 %v427_v58 }
 0x28d   :  { %v646_v61 = vpop.eup %645 }
 0x28e   :  { %v508_v62 = vmul.f32 %v646_v61, %v505_v60 }
 0x2da   :  { %v257_v63 = vpop.permute.xlu1 %256  ;;  %v253_v0 = vpop.permute.xlu0 %252 }
 0x2db   :  { %259 = vst.msk [vmem:[#allocation4] sm:$0x1] %vm249_vm4, %v257_v63  ;;  %255 = vst.msk [vmem:[#allocation3] sm:$0x1] %vm249_vm4, %v253_v0 }
 0x2e2   :  { %v420_v2 = vld [vmem:[#allocation3] sm:$0x1]  ;;  %v421_v6 = vld [vmem:[#allocation4] sm:$0x1] }
 0x2e3   :  { %v430_v3 = vadd.f32 %v420_v2, %v415_v50  ;;  %v509_v9 = vadd.f32 %v508_v62, %v421_v6 }
 0x2e5   :  { %v431_v4 = vadd.f32 %v430_v3, %v273_v1 }
 0x2e7   :  { %v528_v5 = vmul.f32 -1.442695, %v431_v4 }
 0x2e9   :  { %647 = vpow2.f32 %v528_v5 }
 0x2f3   :  { %v648_v7 = vpop.eup %647 }
 0x2f4   :  { %v435_v8 = vadd.f32 1.0, %v648_v7 }
 0x2f6   :  { %649 = vrcp.f32 %v435_v8 }
 0x2f7   :  { %651 = vtanh.f32 %v509_v9 }
 0x300   :  { %v650_v10 = vpop.eup %649 }
 0x301   :  { %v511_v11 = vsub.f32 1.0, %v650_v10  ;;  %v652_v12 = vpop.eup %651  ;;  %v513_v14 = vmul.f32 %v650_v10, %v879_v29 }
 0x303   :  { %v512_v13 = vmul.f32 %v652_v12, %v511_v11 }
 0x305   :  { %v514_v15 = vadd.f32 %v513_v14, %v512_v13 }
 0x307   :  { %515 = vst.msk [vmem:[%s924_s11] sm:$0x1] %vm249_vm4, %v514_v15 }
 0x308   :  { %520 = vsyncpa [#allocation7], 1 }
 0x309   :  { %521 = vsyncpa [#allocation9], 1 }

</bundles_post_ra>
